<compile_context>
chip_gen: v5e
topology: v5e:2x2
jax: 0.10.0
libtpu: 0.0.40
codegen_flags: <defaults>
</compile_context>

<pallas_src>
import functools
import math

import jax
import jax.numpy as jnp
import numpy as np
from jax.experimental import pallas as pl
from jax.experimental.pallas import tpu as pltpu

LANE = 128  # TPU lane width: packed-K block and weight matrices use 128 lanes


# ----------------------------- Pallas kernel ---------------------------------
def tcn_kernel(x_ref, w_ref, o_ref, xp_ref, *, dilations, seq_len, neg_slope):
    """One grid step processes a batch tile of Bt sequences.

    x_ref:  (Bt, L, C)   input sequences, true channel count (no HBM padding)
    w_ref:  (NL, P, P)   packed per-layer weights (bf16).  Row blocks
                         [0,C)=tap k=2 (x[t]), [C,2C)=k=1 (x[t-d]),
                         [2C,3C)=k=0 (x[t-2d]); rows >= 3C and cols >= d_model
                         are zero.
    o_ref:  (Bt, L, D)   output embedding, true d_model channels
    xp_ref: (Bt*L, P)    f32 VMEM scratch used to place the C input channels
                         at lanes [0, C) of a 128-lane activation.
    """
    Bt, L, C = x_ref.shape
    NL, P, _ = w_ref.shape
    D = o_ref.shape[-1]
    M = Bt * L

    # --- one-time lane placement: channels at lanes [0, C), zeros at [C, P) ---
    xp_ref[...] = jnp.zeros_like(xp_ref)
    xp_ref[:, :C] = x_ref[...].reshape(M, C).astype(xp_ref.dtype)
    x = xp_ref[...]                                   # (M, P) f32

    # Within-sequence time index as an (M, 1) column (lane-invariant); the
    # causal masks broadcast over lanes, so rolls never leak across the batch
    # boundary after the (Bt, L) -> (Bt*L,) collapse.
    t = jax.lax.broadcasted_iota(jnp.int32, (M, 1), 0) % seq_len

    for li, d in enumerate(dilations):
        # Causal time shifts (zero padding): sublane roll + within-seq mask.
        x_d = jnp.where(t >= d, pltpu.roll(x, shift=d, axis=0), 0.0)
        # Reuse the already-masked x_d to build the 2d shift.
        x_2d = jnp.where(t >= 2 * d, pltpu.roll(x_d, shift=d, axis=0), 0.0)

        # Pack the 3 taps into one 128-lane K block via lane rolls: the rolled
        # copies carry zeros outside their own C-lane window, so adding them
        # composes the [x | x_d | x_2d | 0] layout exactly.
        packed = (x
                  + pltpu.roll(x_d, shift=C, axis=1)
                  + pltpu.roll(x_2d, shift=2 * C, axis=1))      # (M, P)

        # Single K=128 MXU pass per layer, bf16 operands, f32 accumulation.
        y = jnp.dot(packed.astype(w_ref.dtype), w_ref[li],
                    preferred_element_type=jnp.float32)          # (M, P)

        # LeakyReLU: nn.LeakyReLU(True) -> negative_slope == 1.0 -> identity.
        if neg_slope != 1.0:
            y = jnp.where(y >= 0, y, neg_slope * y)
        # Dropout: identity in eval mode.  Weight cols >= D are zero, so y is
        # already in "channels at lanes [0, C), zeros elsewhere" form.
        x = y

    o_ref[...] = x[:, :D].reshape(Bt, L, D).astype(o_ref.dtype)


def _pick_bt(B, L, target_rows=256):
    """Largest divisor of B with bt*L <= target_rows, keeping grid >= 2 if B >= 2."""
    divisors = [d for d in range(1, B + 1) if B % d == 0]
    min_grid = 2 if B >= 2 else 1
    cands = [d for d in divisors if B // d >= min_grid] or divisors
    fit = [d for d in cands if d * L <= target_rows]
    return max(fit) if fit else min(cands)


def token_tcn_embedding(x, w_fused, dilations, d_model, *, bt=None):
    """x: (B, L, C) f32 channels-last; w_fused: (NL, LANE, LANE) bf16 packed."""
    B, L, C = x.shape
    NL, P, P2 = w_fused.shape
    assert P == LANE and P2 == LANE
    assert 3 * C <= P and d_model <= P
    assert d_model == C, "stacked Sequential requires c_in == d_model"
    assert L % 8 == 0, "sequence length must be a multiple of 8 sublanes"

    if bt is None:
        bt = _pick_bt(B, L)
    assert B % bt == 0

    kernel = functools.partial(
        tcn_kernel, dilations=tuple(dilations), seq_len=L, neg_slope=1.0)

    return pl.pallas_call(
        kernel,
        out_shape=jax.ShapeDtypeStruct((B, L, d_model), x.dtype),
        grid=(B // bt,),
        in_specs=[
            pl.BlockSpec((bt, L, C), lambda b: (b, 0, 0)),
            # Resident packed weights (96 KiB bf16): block index never changes.
            pl.BlockSpec((NL, P, P), lambda b: (0, 0, 0)),
        ],
        out_specs=pl.BlockSpec((bt, L, d_model), lambda b: (b, 0, 0)),
        scratch_shapes=[pltpu.VMEM((bt * L, P), jnp.float32)],
        compiler_params=pltpu.CompilerParams(dimension_semantics=("parallel",)),
    )(x, w_fused)


# -------------------------- parameter construction ---------------------------
def make_weights(key, num_levels, c_in, d_model):
    """Deterministic synthetic weight_norm Conv1d weights.

    Returns:
      w_torch:   list of (d_model, c_in, 3) effective conv weights (PyTorch OIH)
      w_stacked: (num_levels, 3, c_in, d_model) per-tap matrices
    """
    w_torch, w_stacked = [], []
    for li in range(num_levels):
        kv, kg = jax.random.split(jax.random.fold_in(key, li))
        v = jax.random.normal(kv, (d_model, c_in, 3), jnp.float32) * 0.001
        g = jax.random.uniform(kg, (d_model, 1, 1), jnp.float32, 0.5, 1.5)
        norm = jnp.sqrt(jnp.sum(v * v, axis=(1, 2), keepdims=True))
        w = g * v / norm                               # weight_norm reconstruction
        w_torch.append(w)
        w_stacked.append(jnp.transpose(w, (2, 1, 0)))  # (3, c_in, d_model)
    return w_torch, jnp.stack(w_stacked, axis=0)


def fuse_and_pad_weights(w_stacked, lane=LANE, dtype=jnp.bfloat16):
    """Pack the 3 taps into one (lane, lane) matrix per layer.

    Row blocks at offsets 0, C, 2C hold taps k=2, 1, 0 (matching the packed
    activation [x(t) | x(t-d) | x(t-2d) | 0]); rows >= 3C and cols >= d_model
    are zero so layer outputs stay zero beyond the real channels.
    """
    NL, K, C, D = w_stacked.shape
    assert K == 3 and 3 * C <= lane and D <= lane
    w = jnp.zeros((NL, lane, lane), jnp.float32)
    for j, tap in enumerate((2, 1, 0)):
        w = w.at[:, j * C:(j + 1) * C, :D].set(w_stacked[:, tap])
    return w.astype(dtype)


# ---------------------------- pure-JAX reference ------------------------------
def ref_forward(x, w_torch, dilations):
    """Mirrors PyTorch: permute -> [conv1d, chomp, leakyrelu(1.0), dropout(eval)]*N -> transpose."""
    y = jnp.transpose(x, (0, 2, 1))                    # (B, C, L) == x.permute(0, 2, 1)
    L = y.shape[2]
    for W, d in zip(w_torch, dilations):
        p = 2 * d                                      # (kernel_size - 1) * dilation
        out = jax.lax.conv_general_dilated(
            y, W, window_strides=(1,), padding=[(p, p)],
            rhs_dilation=(d,), dimension_numbers=("NCH", "OIH", "NCH"))
        out = out[:, :, :L]                            # Chomp1d(padding)
        out = jnp.where(out >= 0, out, 1.0 * out)      # LeakyReLU(True) -> slope 1.0
        y = out                                        # Dropout: identity (eval)
    return jnp.transpose(y, (0, 2, 1))


# ----------------------------------- main -------------------------------------
if __name__ == "__main__":
    # module hyper-params (c_in must equal d_model for the stacked Sequential)
    c_in = 32
    d_model = 32
    kernel_size = 3
    n_windows = 10
    num_levels = math.ceil(math.log2((n_windows - 1) * (2 - 1) / (kernel_size - 1) + 1))
    dilations = [2 ** i for i in range(num_levels)]    # [1, 2, 4]

    B, L = 2, 16
    key = jax.random.PRNGKey(0)
    kx, kw = jax.random.split(key)
    x = jax.random.normal(kx, (B, L, c_in), jnp.float32)

    w_torch, w_stacked = make_weights(kw, num_levels, c_in, d_model)
    w_fused = fuse_and_pad_weights(w_stacked, LANE, jnp.bfloat16)

    out = jax.block_until_ready(token_tcn_embedding(x, w_fused, dilations, d_model))

    # Reference uses the same bf16-rounded weights the kernel stores, so the
    # only remaining discrepancy is the bf16 cast of the activation operand.
    w_torch_bf16 = [w.astype(jnp.bfloat16).astype(jnp.float32) for w in w_torch]
    ref = jax.block_until_ready(ref_forward(x, w_torch_bf16, dilations))

    np.testing.assert_allclose(np.asarray(out), np.asarray(ref), rtol=2e-2, atol=2e-2)

    print("KERNEL_OK")
</pallas_src>

<mosaic_0001>
module attributes {stable_mosaic.version = 11 : i64} {
  func.func @tcn_kernel(%arg0: i32, %arg1: memref<1x16x32xf32, #tpu.memory_space<vmem>>, %arg2: memref<3x128x128xbf16, #tpu.memory_space<vmem>>, %arg3: memref<1x16x32xf32, #tpu.memory_space<vmem>>, %arg4: memref<16x128xf32, #tpu.memory_space<vmem>>) attributes {dimension_semantics = [#tpu.dimension_semantics<parallel>], iteration_bounds = array<i64: 2>, scalar_prefetch = 0 : i64, scratch_operands = 1 : i64, tpu.core_type = #tpu.core_type<tc>, window_params = [{transform_indices = @transform_0, window_bounds = array<i64: 1, 16, 32>}, {pipeline_mode = #tpu.pipeline_mode<synchronous>, transform_indices = @transform_1, window_bounds = array<i64: 3, 128, 128>}, {transform_indices = @transform_2, window_bounds = array<i64: 1, 16, 32>}]} {
    %cst = arith.constant 0.000000e+00 : f32
    %0 = vector.broadcast %cst : f32 to vector<16x128xf32>
    %c0 = arith.constant 0 : index
    %c0_0 = arith.constant 0 : index
    %1 = vector.load %arg4[%c0, %c0_0] : memref<16x128xf32, #tpu.memory_space<vmem>>, vector<16x128xf32>
    tpu.vector_store %arg4[%c0, %c0_0], %0 {strides = array<i32>} : memref<16x128xf32, #tpu.memory_space<vmem>>, vector<16x128xf32>,
    %c0_1 = arith.constant 0 : index
    %c0_2 = arith.constant 0 : index
    %c0_3 = arith.constant 0 : index
    %2 = vector.load %arg1[%c0_1, %c0_2, %c0_3] : memref<1x16x32xf32, #tpu.memory_space<vmem>>, vector<1x16x32xf32>
    %3 = vector.shape_cast %2 : vector<1x16x32xf32> to vector<16x32xf32>
    %c0_4 = arith.constant 0 : index
    %c0_5 = arith.constant 0 : index
    %4 = vector.load %arg4[%c0_4, %c0_5] : memref<16x128xf32, #tpu.memory_space<vmem>>, vector<16x32xf32>
    tpu.vector_store %arg4[%c0_4, %c0_5], %3 {strides = array<i32>} : memref<16x128xf32, #tpu.memory_space<vmem>>, vector<16x32xf32>,
    %c0_6 = arith.constant 0 : index
    %c0_7 = arith.constant 0 : index
    %5 = vector.load %arg4[%c0_6, %c0_7] : memref<16x128xf32, #tpu.memory_space<vmem>>, vector<16x128xf32>
    %6 = tpu.iota {dimensions = array<i32: 0>} : vector<16x1xi32>
    %c16_i32 = arith.constant 16 : i32
    %c0_i32 = arith.constant 0 : i32
    %7 = arith.cmpi eq, %c16_i32, %c0_i32 : i32
    %c1_i32 = arith.constant 1 : i32
    %8 = arith.select %7, %c1_i32, %c16_i32 : i32
    %9 = vector.broadcast %8 : i32 to vector<16x1xi32>
    %10 = arith.remsi %6, %9 : vector<16x1xi32>
    %c0_i32_8 = arith.constant 0 : i32
    %11 = vector.broadcast %c0_i32_8 : i32 to vector<16x1xi32>
    %12 = arith.cmpi ne, %10, %11 : vector<16x1xi32>
    %c0_i32_9 = arith.constant 0 : i32
    %13 = vector.broadcast %c0_i32_9 : i32 to vector<16x1xi32>
    %14 = arith.cmpi slt, %10, %13 : vector<16x1xi32>
    %c0_i32_10 = arith.constant 0 : i32
    %15 = arith.cmpi slt, %8, %c0_i32_10 : i32
    %16 = vector.broadcast %15 : i1 to vector<16x1xi1>
    %17 = vector.broadcast %16 : vector<16x1xi1> to vector<16x1xi1>
    %18 = arith.xori %14, %17 : vector<16x1xi1>
    %19 = arith.andi %18, %12 : vector<16x1xi1>
    %20 = vector.broadcast %8 : i32 to vector<16x1xi32>
    %21 = arith.addi %10, %20 : vector<16x1xi32>
    %22 = arith.select %19, %21, %10 : vector<16x1xi1>, vector<16x1xi32>
    %c1_i32_11 = arith.constant 1 : i32
    %23 = vector.broadcast %c1_i32_11 : i32 to vector<16x1xi32>
    %24 = arith.cmpi sge, %22, %23 : vector<16x1xi32>
    %c1_i32_12 = arith.constant 1 : i32
    %25 = tpu.dynamic_rotate %5 by %c1_i32_12 dim 0 : vector<16x128xf32>, i32 -> vector<16x128xf32>
    %cst_13 = arith.constant 0.000000e+00 : f32
    %26 = vector.shape_cast %24 : vector<16x1xi1> to vector<16x1xi1>
    %27 = vector.broadcast %26 : vector<16x1xi1> to vector<16x128xi1>
    %28 = vector.broadcast %cst_13 : f32 to vector<16x128xf32>
    %29 = arith.select %27, %25, %28 : vector<16x128xi1>, vector<16x128xf32>
    %c2_i32 = arith.constant 2 : i32
    %30 = vector.broadcast %c2_i32 : i32 to vector<16x1xi32>
    %31 = arith.cmpi sge, %22, %30 : vector<16x1xi32>
    %c1_i32_14 = arith.constant 1 : i32
    %32 = tpu.dynamic_rotate %29 by %c1_i32_14 dim 0 : vector<16x128xf32>, i32 -> vector<16x128xf32>
    %cst_15 = arith.constant 0.000000e+00 : f32
    %33 = vector.shape_cast %31 : vector<16x1xi1> to vector<16x1xi1>
    %34 = vector.broadcast %33 : vector<16x1xi1> to vector<16x128xi1>
    %35 = vector.broadcast %cst_15 : f32 to vector<16x128xf32>
    %36 = arith.select %34, %32, %35 : vector<16x128xi1>, vector<16x128xf32>
    %c32_i32 = arith.constant 32 : i32
    %37 = tpu.dynamic_rotate %29 by %c32_i32 dim 1 : vector<16x128xf32>, i32 -> vector<16x128xf32>
    %38 = arith.addf %5, %37 : vector<16x128xf32>
    %c64_i32 = arith.constant 64 : i32
    %39 = tpu.dynamic_rotate %36 by %c64_i32 dim 1 : vector<16x128xf32>, i32 -> vector<16x128xf32>
    %40 = arith.addf %38, %39 : vector<16x128xf32>
    %41 = arith.truncf %40 : vector<16x128xf32> to vector<16x128xbf16>
    %c0_16 = arith.constant 0 : index
    %c0_17 = arith.constant 0 : index
    %c0_18 = arith.constant 0 : index
    %42 = vector.load %arg2[%c0_16, %c0_17, %c0_18] : memref<3x128x128xbf16, #tpu.memory_space<vmem>>, vector<1x128x128xbf16>
    %43 = vector.shape_cast %42 : vector<1x128x128xbf16> to vector<128x128xbf16>
    %cst_19 = arith.constant dense<0.000000e+00> : vector<16x128xf32>
    %44 = tpu.matmul %41, %43, %cst_19 {dimension_numbers = #tpu.dot_dimension_numbers<[1], [0], [0], [1], [0, 0, 1, 1], [], []>} : vector<16x128xbf16>, vector<128x128xbf16>, vector<16x128xf32> -> vector<16x128xf32>
    %c2_i32_20 = arith.constant 2 : i32
    %45 = vector.broadcast %c2_i32_20 : i32 to vector<16x1xi32>
    %46 = arith.cmpi sge, %22, %45 : vector<16x1xi32>
    %c2_i32_21 = arith.constant 2 : i32
    %47 = tpu.dynamic_rotate %44 by %c2_i32_21 dim 0 : vector<16x128xf32>, i32 -> vector<16x128xf32>
    %cst_22 = arith.constant 0.000000e+00 : f32
    %48 = vector.shape_cast %46 : vector<16x1xi1> to vector<16x1xi1>
    %49 = vector.broadcast %48 : vector<16x1xi1> to vector<16x128xi1>
    %50 = vector.broadcast %cst_22 : f32 to vector<16x128xf32>
    %51 = arith.select %49, %47, %50 : vector<16x128xi1>, vector<16x128xf32>
    %c4_i32 = arith.constant 4 : i32
    %52 = vector.broadcast %c4_i32 : i32 to vector<16x1xi32>
    %53 = arith.cmpi sge, %22, %52 : vector<16x1xi32>
    %c2_i32_23 = arith.constant 2 : i32
    %54 = tpu.dynamic_rotate %51 by %c2_i32_23 dim 0 : vector<16x128xf32>, i32 -> vector<16x128xf32>
    %cst_24 = arith.constant 0.000000e+00 : f32
    %55 = vector.shape_cast %53 : vector<16x1xi1> to vector<16x1xi1>
    %56 = vector.broadcast %55 : vector<16x1xi1> to vector<16x128xi1>
    %57 = vector.broadcast %cst_24 : f32 to vector<16x128xf32>
    %58 = arith.select %56, %54, %57 : vector<16x128xi1>, vector<16x128xf32>
    %c32_i32_25 = arith.constant 32 : i32
    %59 = tpu.dynamic_rotate %51 by %c32_i32_25 dim 1 : vector<16x128xf32>, i32 -> vector<16x128xf32>
    %60 = arith.addf %44, %59 : vector<16x128xf32>
    %c64_i32_26 = arith.constant 64 : i32
    %61 = tpu.dynamic_rotate %58 by %c64_i32_26 dim 1 : vector<16x128xf32>, i32 -> vector<16x128xf32>
    %62 = arith.addf %60, %61 : vector<16x128xf32>
    %63 = arith.truncf %62 : vector<16x128xf32> to vector<16x128xbf16>
    %c1 = arith.constant 1 : index
    %c0_27 = arith.constant 0 : index
    %c0_28 = arith.constant 0 : index
    %64 = vector.load %arg2[%c1, %c0_27, %c0_28] : memref<3x128x128xbf16, #tpu.memory_space<vmem>>, vector<1x128x128xbf16>
    %65 = vector.shape_cast %64 : vector<1x128x128xbf16> to vector<128x128xbf16>
    %cst_29 = arith.constant dense<0.000000e+00> : vector<16x128xf32>
    %66 = tpu.matmul %63, %65, %cst_29 {dimension_numbers = #tpu.dot_dimension_numbers<[1], [0], [0], [1], [0, 0, 1, 1], [], []>} : vector<16x128xbf16>, vector<128x128xbf16>, vector<16x128xf32> -> vector<16x128xf32>
    %c4_i32_30 = arith.constant 4 : i32
    %67 = vector.broadcast %c4_i32_30 : i32 to vector<16x1xi32>
    %68 = arith.cmpi sge, %22, %67 : vector<16x1xi32>
    %c4_i32_31 = arith.constant 4 : i32
    %69 = tpu.dynamic_rotate %66 by %c4_i32_31 dim 0 : vector<16x128xf32>, i32 -> vector<16x128xf32>
    %cst_32 = arith.constant 0.000000e+00 : f32
    %70 = vector.shape_cast %68 : vector<16x1xi1> to vector<16x1xi1>
    %71 = vector.broadcast %70 : vector<16x1xi1> to vector<16x128xi1>
    %72 = vector.broadcast %cst_32 : f32 to vector<16x128xf32>
    %73 = arith.select %71, %69, %72 : vector<16x128xi1>, vector<16x128xf32>
    %c8_i32 = arith.constant 8 : i32
    %74 = vector.broadcast %c8_i32 : i32 to vector<16x1xi32>
    %75 = arith.cmpi sge, %22, %74 : vector<16x1xi32>
    %c4_i32_33 = arith.constant 4 : i32
    %76 = tpu.dynamic_rotate %73 by %c4_i32_33 dim 0 : vector<16x128xf32>, i32 -> vector<16x128xf32>
    %cst_34 = arith.constant 0.000000e+00 : f32
    %77 = vector.shape_cast %75 : vector<16x1xi1> to vector<16x1xi1>
    %78 = vector.broadcast %77 : vector<16x1xi1> to vector<16x128xi1>
    %79 = vector.broadcast %cst_34 : f32 to vector<16x128xf32>
    %80 = arith.select %78, %76, %79 : vector<16x128xi1>, vector<16x128xf32>
    %c32_i32_35 = arith.constant 32 : i32
    %81 = tpu.dynamic_rotate %73 by %c32_i32_35 dim 1 : vector<16x128xf32>, i32 -> vector<16x128xf32>
    %82 = arith.addf %66, %81 : vector<16x128xf32>
    %c64_i32_36 = arith.constant 64 : i32
    %83 = tpu.dynamic_rotate %80 by %c64_i32_36 dim 1 : vector<16x128xf32>, i32 -> vector<16x128xf32>
    %84 = arith.addf %82, %83 : vector<16x128xf32>
    %85 = arith.truncf %84 : vector<16x128xf32> to vector<16x128xbf16>
    %c2 = arith.constant 2 : index
    %c0_37 = arith.constant 0 : index
    %c0_38 = arith.constant 0 : index
    %86 = vector.load %arg2[%c2, %c0_37, %c0_38] : memref<3x128x128xbf16, #tpu.memory_space<vmem>>, vector<1x128x128xbf16>
    %87 = vector.shape_cast %86 : vector<1x128x128xbf16> to vector<128x128xbf16>
    %cst_39 = arith.constant dense<0.000000e+00> : vector<16x128xf32>
    %88 = tpu.matmul %85, %87, %cst_39 {dimension_numbers = #tpu.dot_dimension_numbers<[1], [0], [0], [1], [0, 0, 1, 1], [], []>} : vector<16x128xbf16>, vector<128x128xbf16>, vector<16x128xf32> -> vector<16x128xf32>
    %89 = vector.extract_strided_slice %88 {offsets = [0, 0], sizes = [16, 32], strides = [1, 1]} : vector<16x128xf32> to vector<16x32xf32>
    %90 = vector.shape_cast %89 : vector<16x32xf32> to vector<1x16x32xf32>
    %c0_40 = arith.constant 0 : index
    %c0_41 = arith.constant 0 : index
    %c0_42 = arith.constant 0 : index
    %91 = vector.load %arg3[%c0_40, %c0_41, %c0_42] : memref<1x16x32xf32, #tpu.memory_space<vmem>>, vector<1x16x32xf32>
    tpu.vector_store %arg3[%c0_40, %c0_41, %c0_42], %90 {strides = array<i32>} : memref<1x16x32xf32, #tpu.memory_space<vmem>>, vector<1x16x32xf32>,
    return
  }
  func.func @transform_0(%arg0: i32) -> (i32, i32, i32) {
    %c0_i32 = arith.constant 0 : i32
    %c0_i32_0 = arith.constant 0 : i32
    %c0_i32_1 = arith.constant 0 : i32
    return %arg0, %c0_i32, %c0_i32_0 : i32, i32, i32
  }
  func.func @transform_1(%arg0: i32) -> (i32, i32, i32) {
    %c0_i32 = arith.constant 0 : i32
    %c0_i32_0 = arith.constant 0 : i32
    %c0_i32_1 = arith.constant 0 : i32
    %c0_i32_2 = arith.constant 0 : i32
    return %c0_i32, %c0_i32_0, %c0_i32_1 : i32, i32, i32
  }
  func.func @transform_2(%arg0: i32) -> (i32, i32, i32) {
    %c0_i32 = arith.constant 0 : i32
    %c0_i32_0 = arith.constant 0 : i32
    %c0_i32_1 = arith.constant 0 : i32
    return %arg0, %c0_i32, %c0_i32_0 : i32, i32, i32
  }
}

</mosaic_0001>

<bundles_post_ra>
// kernel: tpu_custom_call.1
= control target key start
LH: loop header
LB: loop body
LE: loop exit
PB: predicated region body
PF: predicated region fallthrough
CT: control target
= control target key end

     0   :  { %7 = vsyncpa [#allocation4], 0  ;;  %s1207_s0 = inlined_call_operand.hbm [shape: f32[2,16,32], index: 0, kind: input, shape index: {}]   ;;  %s1208_s1 = inlined_call_operand.hbm [shape: bf16[3,128,128], index: 1, kind: input, shape index: {}]   ;;  %s1209_s2 = inlined_call_operand.hbm [shape: f32[2,16,32], index: 2, kind: output, shape index: {}]  }
   0x1   :  { %9 = vsyncpa [#allocation4 + $0x1], 0 }
   0x2   :  { %10 = vsyncpa [#allocation7], 0 }
   0x3   :  { %11 = vsyncpa [#allocation5], 0 }
   0x4   :  { %13 = vsyncpa [#allocation5 + $0x1], 0  ;;  %s1017_s9 = smov 0   ;;  %s1019_s10 = smov 0  }
   0x5   :  { %s1021_s11 = smov 0   ;;  %s1023_s12 = smov 0  }
   0x6 LB: > { %s1038_s13 = sadd.s32 4294967295, %s990_s12   ;;  %s656_s14 = sadd.s32 4294967294, %s990_s12   ;;  %s990_s12 = sphi %s1023_s12, %s1219_s12   ;;  %s986_s11 = sphi %s1021_s11, %s1218_s11   ;;  %s982_s10 = sphi %s1019_s10, %s1217_s10   ;;  %s978_s9 = sphi %s1017_s9, %s1216_s9  }
   0x7   : > { %p39_p0 = scmp.ne.s32.totalorder %s982_s10, %s978_s9  ;;  %p40_p1 = scmp.eq.s32.totalorder %s1038_s13, 0 }
   0x8   : > { %p84_p2 = scmp.eq.s32.totalorder %s1038_s13, 1  ;;  %p90_p3 = scmp.eq.s32.totalorder %s656_s14, 1 }
   0x9   : > { %p1047_p4 = por %p40_p1, %p39_p0  ;;  %p657_p5 = scmp.ge.s32.totalorder %s990_s12, 1 }
   0xa   : > { %p1052_p6 = por %p90_p3, %p39_p0  ;;  %p97_p7 = scmp.lt.s32.totalorder %s990_s12, 3 }
   0xb   : > { %s108_s19 = sshll.u32 %s1208_s1, 4  ;;  %s992_s21 = smov [#allocation6]   ;;  %s109_s19 = int_to_ptr.hbm [resolvable:$true] %s108_s19 }
   0xc   : > { %p1060_p8 = pnand %p657_p5, %p97_p7  ;;  %s110_s22 = sshll.u32 %s992_s21, 4  ;;  %s111_s22 = int_to_ptr.vmem [resolvable:$true] %s110_s22 }
   0xd   : > { %s1070_s23 = sadd.s32 1, %s990_s12   ;;  %s993_s24 = smov 64  }
   0xe   : > { %p802_p9 = pneg %p1060_p8  ;;  %s994_s25 = smov 4  }
   0xf   : > { %s23_s26 = ssub.s32 %s990_s12, %s1070_s23  ;;  %s26_s27 = sadd.s32 1, %s986_s11 }
  0x10   : > { %p803_p10 = pnand %p802_p9, %p40_p1  ;;  %p24_p12 = scmp.eq.s32.totalorder %s23_s26, 0 }
  0x11   : > { %p33_p13 = scmp.ne.s32.totalorder %s986_s11, %s982_s10  ;;  %p34_p0 = scmp.eq.s32.totalorder %s990_s12, 0 }
  0x12   : > { %805 = dma.hbm_to_vmem [thread:$0]  (!%p803_p10), %s109_s19, 3072, %s111_s22, [#allocation7], %s993_s24, %s993_s24, %s994_s25  }
  0x13   : > { %p815_p3 = scmp.lt.s32.totalorder %s990_s12, 2  ;;  %p35_p5 = por %p34_p0, %p33_p13 }
  0x14   : > { %s1080_s28 = scalar_select %p24_p12, %s986_s11, %s26_s27  }
  0x15   : > { %p1084_p7 = por %p84_p2, %p33_p13  ;;  %s124_s30 = sand.u32 1, %s986_s11  }
  0x16   : > { %s768_s3 = sshll.u32 %s990_s12, 4  ;;  %s660_s4 = sshll.u32 %s124_s30, 4 }
  0x17   : > { %s133_s7 = scalar_lea.hbm %s1207_s0, %s768_s3  ;;  %s128_s14 = scalar_lea.vmem [#allocation3], %s660_s4 }
  0x18   : > { %s134_s8 = sshll.u32 %s133_s7, 4  ;;  %s136_s17 = sshll.u32 %s128_s14, 4  ;;  %s135_s8 = int_to_ptr.hbm [resolvable:$true] %s134_s8  ;;  %s137_s17 = int_to_ptr.vmem [resolvable:$true] %s136_s17 }
  0x19   : > { %p1095_p9 = pnand %p815_p3, %p35_p5  ;;  %s125_s19 = scalar_lea.sflag [#allocation4], %s124_s30 }
  0x1a   : > { %s890_s21 = sshra.s32 %s135_s8, 4  ;;  %s897_s26 = scalar_lea.hbm %s1207_s0, 32  ;;  %s891_s21 = int_to_ptr.hbm [resolvable:$true] %s890_s21 }
  0x1b   : > { %s892_s22 = scalar_lea.hbm %s891_s21, 16  ;;  %p894_p10 = pneg %p1095_p9 }
  0x1c   : > { %p893_p2 = scmp.ne.s32.totalorder %s891_s21, %s892_s22  ;;  %p898_p0 = scmp.lt.s32.totalorder %s891_s21, %s1207_s0 }
  0x1d   : > { %p899_p3 = scmp.lt.s32.totalorder %s897_s26, %s892_s22 }
  0x1e   : > { %p895_p12 = pnand %p894_p10, %p893_p2 }
  0x1f   : > { %p900_p5 = por %p899_p3, %p898_p0 }
  0x20   : > { %p896_p13 = pneg %p895_p12 }
  0x22   : > { %p901_p11 = pnand %p900_p5, %p896_p13 }
  0x24   : > { %904 = shalt.err (!%p901_p11)
}
  0x25   : > { %s995_s30 = smov 128   ;;  %s996_s4 = smov 8  }
  0x26   : > { %809 = dma.hbm_to_vmem [thread:$0]  (!%p1095_p9), %s135_s8, 256, %s137_s17, %s125_s19, %s995_s30, %s995_s30, %s996_s4  }
  0x27   : > { %148 = sbr.rel (%p1060_p8) target bundleno = 857 (0x359), region = 28  ;;  %s1112_s5 = sand.u32 (!%p1060_p8), 1, %s982_s10  }
  0x28   : > { %s664_s6 = sshll.u32 (!%p1060_p8), %s1112_s5, 4  ;;  %s151_s7 = scalar_lea.sflag (!%p1060_p8), [#allocation4], %s1112_s5 }
  0x29   : > { %s154_s14 = scalar_lea.vmem (!%p1060_p8), [#allocation3], %s664_s6 }
  0x2c   : > { %965 = dma.done.wait (%p1047_p4), %s151_s7, 256  }
  0x2d   : > { %967 = vsyncadd (%p1047_p4), %s151_s7, 4294967040 }
  0x2e   : > { %969 = dma.done.wait (%p40_p1), [#allocation7], 3072  }
  0x2f   : > { %971 = vsyncadd (%p40_p1), [#allocation7], 4294964224  ;;  %v997_v0 = vmov 0.0   ;;  %vm185_vm0 = vcmask 261120   ;;  %v190_v1 = vlaneseq  ;;  %v183_v2 = vld [vmem:[%s154_s14] sm:$0xff]  ;;  %v184_v3 = vld [vmem:[%s154_s14 + $0x8] sm:$0xff] }
  0x30   : > { %181 = vst [vmem:[#allocation2] sm:$0xff] %v997_v0  ;;  %v776_v4 = vld [vmem:[#allocation6 + $0x38] sm:$0xff]  ;;  %v775_v6 = vld [vmem:[#allocation6 + $0x30] sm:$0xff]  ;;  %v774_v8 = vld [vmem:[#allocation6 + $0x28] sm:$0xff]  ;;  %s998_s15 = smov 32   ;;  %s999_s20 = smov 64  }
  0x31   : > { %182 = vst [vmem:[#allocation2 + $0x8] sm:$0xff] %v997_v0  ;;  %v1130_v5 = vshrl.u32 %v190_v1, 7  ;;  %319 = vmatpush.bf16.msra.mxu0 %v776_v4  ;;  %v773_v13 = vld [vmem:[#allocation6 + $0x20] sm:$0xff]  ;;  %v772_v19 = vld [vmem:[#allocation6 + $0x18] sm:$0xff]  ;;  %v771_v23 = vld [vmem:[#allocation6 + $0x10] sm:$0xff]  ;;  %s793_s8 = sshll.u32 %s1038_s13, 4 }
  0x32   : > { %186 = vst.msk [vmem:[#allocation2] sm:$0xff] %vm185_vm0, %v183_v2  ;;  %v770_v24 = vld [vmem:[#allocation6 + $0x8] sm:$0xff]  ;;  %v769_v25 = vld [vmem:[#allocation6] sm:$0xff]  ;;  %v784_v47 = vld [vmem:[#allocation6 + $0x78] sm:$0xff]  ;;  %s569_s19 = scalar_lea.hbm %s1209_s2, %s793_s8  ;;  %s180_s21 = scalar_lea.vmem [#allocation8], %s664_s6 }
  0x33   : > { %187 = vst.msk [vmem:[#allocation2 + $0x8] sm:$0xff] %vm185_vm0, %v184_v3  ;;  %v1133_v7 = vand.u32 15, %v1130_v5  ;;  %vm221_vm1 = vcmp.lt.s32.totalorder %v1130_v5, 1  ;;  %vm335_vm4 = vcmp.lt.s32.totalorder %v1130_v5, 2  ;;  %430 = vmatpush.bf16.msra.mxu1 %v784_v47  ;;  %v783_v48 = vld [vmem:[#allocation6 + $0x70] sm:$0xff]  ;;  %v782_v49 = vld [vmem:[#allocation6 + $0x68] sm:$0xff] }
  0x34   : > { %v781_v50 = vld [vmem:[#allocation6 + $0x60] sm:$0xff]  ;;  %v780_v51 = vld [vmem:[#allocation6 + $0x58] sm:$0xff]  ;;  %v779_v52 = vld [vmem:[#allocation6 + $0x50] sm:$0xff]  ;;  %vm446_vm6 = vcmp.lt.s32.totalorder %v1130_v5, 4  ;;  %s570_s22 = sshll.u32 %s180_s21, 4  ;;  %s572_s24 = sshll.u32 %s569_s19, 4  ;;  %s571_s22 = int_to_ptr.vmem [resolvable:$true] %s570_s22  ;;  %s573_s24 = int_to_ptr.hbm [resolvable:$true] %s572_s24 }
  0x35   : > { %320 = vmatpush.bf16.msra.mxu0 %v775_v6  ;;  %vm217_vm2 = vcmp.ge.s32.totalorder %v1133_v7, 1  ;;  %vm230_vm3 = vcmp.ge.s32.totalorder %v1133_v7, 2  ;;  %vm340_vm5 = vcmp.ge.s32.totalorder %v1133_v7, 4  ;;  %v778_v53 = vld [vmem:[#allocation6 + $0x48] sm:$0xff]  ;;  %v777_v54 = vld [vmem:[#allocation6 + $0x40] sm:$0xff]  ;;  %s558_s25 = scalar_lea.sflag [#allocation5], %s1112_s5 }
  0x36   : > { %v789_v5 = vld [vmem:[#allocation6 + $0xa0] sm:$0xff]  ;;  %v786_v7 = vld [vmem:[#allocation6 + $0x88] sm:$0xff]  ;;  %s934_s26 = sshra.s32 %s573_s24, 4  ;;  %s940_s30 = scalar_lea.hbm %s1209_s2, 32  ;;  %s935_s26 = int_to_ptr.hbm [resolvable:$true] %s934_s26 }
  0x37   : > { %431 = vmatpush.bf16.msra.mxu1 %v783_v48  ;;  %s936_s13 = scalar_lea.hbm %s935_s26, 16  ;;  %p941_p11 = scmp.lt.s32.totalorder %s935_s26, %s1209_s2 }
  0x38   : > { %p937_p1 = scmp.ne.s32.totalorder %s935_s26, %s936_s13  ;;  %p942_p9 = scmp.lt.s32.totalorder %s940_s30, %s936_s13 }
  0x39   : > { %v188_v9 = vld [vmem:[#allocation2] sm:$0xff]  ;;  %321 = vmatpush.bf16.msra.mxu0 %v774_v8 }
  0x3a   : > { %v189_v10 = vld [vmem:[#allocation2 + $0x8] sm:$0xff]  ;;  %v219_v11 = vrot.slane %v188_v9, 7  ;;  %p938_p4 = pnand %p937_p1, %p1084_p7  ;;  %p943_p2 = por %p942_p9, %p941_p11 }
  0x3b   : > { %v220_v12 = vrot.slane %v189_v10, 7  ;;  %432 = vmatpush.bf16.msra.mxu1 %v782_v49 }
  0x3c   : > { %p939_p8 = pneg %p938_p4 }
  0x3d   : > { %v223_v14 = vsel %vm221_vm1, %v220_v12, %v219_v11  ;;  %v222_v15 = vsel %vm221_vm1, %v219_v11, %v220_v12  ;;  %322 = vmatpush.bf16.msra.mxu0 %v773_v13  ;;  %v791_v13 = vld [vmem:[#allocation6 + $0xb0] sm:$0xff] }
  0x3e   : > { %v228_v16 = vsel %vm217_vm2, %v223_v14, 0.0  ;;  %v233_v17 = vrot.slane %v222_v15, 7  ;;  %v790_v14 = vld [vmem:[#allocation6 + $0xa8] sm:$0xff]  ;;  %p944_p10 = pnand %p943_p2, %p939_p8 }
  0x3f   : > { %242 = vrot.lane.b32.xlu0 %v228_v16, %s998_s15  ;;  %v232_v18 = vrot.slane %v228_v16, 7  ;;  %433 = vmatpush.bf16.msra.mxu1 %v781_v50  ;;  %v787_v16 = vld [vmem:[#allocation6 + $0x90] sm:$0xff] }
  0x41   : > { %v235_v20 = vsel %vm221_vm1, %v233_v17, %v232_v18  ;;  %323 = vmatpush.bf16.msra.mxu0 %v772_v19  ;;  %v234_v22 = vsel %vm221_vm1, %v232_v18, %v233_v17  ;;  %v785_v17 = vld [vmem:[#allocation6 + $0x80] sm:$0xff] }
  0x42   : > { %v240_v21 = vsel %vm230_vm3, %v235_v20, 0.0 }
  0x43   : > { %248 = vrot.lane.b32.xlu1 %v240_v21, %s999_s20  ;;  %434 = vmatpush.bf16.msra.mxu1 %v780_v51 }
  0x45   : > { %324 = vmatpush.bf16.msra.mxu0 %v771_v23 }
  0x47   : > { %244 = vrot.lane.b32.xlu0 %v222_v15, %s998_s15  ;;  %435 = vmatpush.bf16.msra.mxu1 %v779_v52  ;;  %v788_v15 = vld [vmem:[#allocation6 + $0x98] sm:$0xff] }
  0x49   : > { %325 = vmatpush.bf16.msra.mxu0 %v770_v24 }
  0x4b   : > { %250 = vrot.lane.b32.xlu1 %v234_v22, %s999_s20  ;;  %436 = vmatpush.bf16.msra.mxu1 %v778_v53 }
  0x4d   : > { %326 = vmatpush.bf16.msra.mxu0 %v769_v25 }
  0x4f   : > { %437 = vmatpush.bf16.msra.mxu1 %v777_v54 }
  0xb1   : > { %v243_v26 = vpop.permute.xlu0 %242 }
  0xb2   : > { %v246_v29 = vadd.f32 %v243_v26, %v188_v9 }
  0xb5   : > { %v249_v27 = vpop.permute.xlu1 %248 }
  0xb6   : > { %v252_v32 = vadd.f32 %v249_v27, %v246_v29 }
  0xb9   : > { %v245_v28 = vpop.permute.xlu0 %244 }
  0xba   : > { %v247_v30 = vadd.f32 %v245_v28, %v189_v10 }
  0xbd   : > { %v251_v31 = vpop.permute.xlu1 %250 }
  0xbe   : > { %v253_v33 = vadd.f32 %v251_v31, %v247_v30 }
  0xc0   : > { %v254_v34 = vpack.c.bf16 %v253_v33, %v252_v32 }
  0xc2   : > { %327 = vmatmul.bf16.vlgmr.msra.gmra.mxu0 %v254_v34 }
 0x13f   : > { %v328_v35 = vpop.f32.mrf.mxu0 }
 0x140   : > { %v333_v37 = vrot.slane %v328_v35, 6 }
 0x147   : > { %v330_v36 = vpop.f32.mrf.mxu0 }
 0x148   : > { %v334_v38 = vrot.slane %v330_v36, 6 }
 0x14a   : > { %v336_v39 = vsel %vm335_vm4, %v333_v37, %v334_v38  ;;  %v337_v40 = vsel %vm335_vm4, %v334_v38, %v333_v37 }
 0x14b   : > { %v343_v41 = vrot.slane %v336_v39, 6  ;;  %v338_v42 = vsel %vm230_vm3, %v337_v40, 0.0 }
 0x14c   : > { %352 = vrot.lane.b32.xlu2 %v338_v42, %s998_s15  ;;  %v342_v43 = vrot.slane %v338_v42, 6 }
 0x14e   : > { %v344_v44 = vsel %vm335_vm4, %v342_v43, %v343_v41  ;;  %v345_v45 = vsel %vm335_vm4, %v343_v41, %v342_v43 }
 0x14f   : > { %360 = vrot.lane.b32.xlu1 %v344_v44, %s999_s20  ;;  %v350_v46 = vsel %vm340_vm5, %v345_v45, 0.0 }
 0x150   : > { %358 = vrot.lane.b32.xlu0 %v350_v46, %s999_s20 }
 0x154   : > { %354 = vrot.lane.b32.xlu2 %v336_v39, %s998_s15 }
 0x157   : > { %469 = vrot.lane.b32.xlu1 %v997_v0, %s999_s20  ;;  %v792_v0 = vld [vmem:[#allocation6 + $0xb8] sm:$0xff] }
 0x158   : > { %541 = vmatpush.bf16.msra.mxu2 %v792_v0 }
 0x15c   : > { %542 = vmatpush.bf16.msra.mxu2 %v791_v13 }
 0x160   : > { %543 = vmatpush.bf16.msra.mxu2 %v790_v14 }
 0x164   : > { %544 = vmatpush.bf16.msra.mxu2 %v789_v5 }
 0x168   : > { %545 = vmatpush.bf16.msra.mxu2 %v788_v15 }
 0x16c   : > { %546 = vmatpush.bf16.msra.mxu2 %v787_v16 }
 0x170   : > { %547 = vmatpush.bf16.msra.mxu2 %v786_v7 }
 0x174   : > { %548 = vmatpush.bf16.msra.mxu2 %v785_v17 }
 0x1a6   : > { %v353_v55 = vpop.permute.xlu2 %352 }
 0x1a7   : > { %v356_v58 = vadd.f32 %v353_v55, %v328_v35 }
 0x1ae   : > { %v355_v56 = vpop.permute.xlu2 %354 }
 0x1af   : > { %v357_v57 = vadd.f32 %v355_v56, %v330_v36 }
 0x1c1   : > { %v361_v59 = vpop.permute.xlu1 %360 }
 0x1c2   : > { %v363_v60 = vadd.f32 %v361_v59, %v357_v57  ;;  %v359_v61 = vpop.permute.xlu0 %358 }
 0x1c3   : > { %v362_v62 = vadd.f32 %v359_v61, %v356_v58 }
 0x1c5   : > { %v364_v63 = vpack.c.bf16 %v363_v60, %v362_v62 }
 0x1c7   : > { %438 = vmatmul.bf16.vlgmr.msra.gmra.mxu1 %v364_v63 }
 0x1c9   : > { %v470_v20 = vpop.permute.xlu1 %469 }
 0x244   : > { %v439_v1 = vpop.f32.mrf.mxu1 }
 0x245   : > { %v444_v3 = vrot.slane %v439_v1, 4 }
 0x24c   : > { %v441_v2 = vpop.f32.mrf.mxu1 }
 0x24d   : > { %v445_v4 = vrot.slane %v441_v2, 4 }
 0x24f   : > { %v447_v6 = vsel %vm446_vm6, %v444_v3, %v445_v4  ;;  %v448_v8 = vsel %vm446_vm6, %v445_v4, %v444_v3 }
 0x250   : > { %465 = vrot.lane.b32.xlu0 %v447_v6, %s998_s15  ;;  %v449_v9 = vsel %vm340_vm5, %v448_v8, 0.0  ;;  %v454_v10 = vrot.slane %v447_v6, 4 }
 0x251   : > { %463 = vrot.lane.b32.xlu2 %v449_v9, %s998_s15  ;;  %v453_v11 = vrot.slane %v449_v9, 4 }
 0x253   : > { %v455_v12 = vsel %vm446_vm6, %v453_v11, %v454_v10 }
 0x259   : > { %471 = vrot.lane.b32.xlu2 %v455_v12, %s999_s20 }
 0x2ab   : > { %v464_v18 = vpop.permute.xlu2 %463 }
 0x2ac   : > { %v467_v19 = vadd.f32 %v464_v18, %v439_v1 }
 0x2ae   : > { %v473_v24 = vadd.f32 %v470_v20, %v467_v19 }
 0x2b3   : > { %v472_v23 = vpop.permute.xlu2 %471 }
 0x2c2   : > { %v466_v21 = vpop.permute.xlu0 %465 }
 0x2c3   : > { %v468_v22 = vadd.f32 %v466_v21, %v441_v2 }
 0x2c5   : > { %v474_v25 = vadd.f32 %v472_v23, %v468_v22 }
 0x2c7   : > { %v475_v26 = vpack.c.bf16 %v474_v25, %v473_v24 }
 0x2c9   : > { %549 = vmatmul.bf16.vlgmr.msra.gmra.mxu2 %v475_v26 }
 0x34c   : > { %v550_v27 = vpop.f32.mrf.mxu2 }
 0x34d   : > { %555 = vst.msk [vmem:[%s180_s21] sm:$0xff] %vm185_vm0, %v550_v27 }
 0x354   : > { %v552_v28 = vpop.f32.mrf.mxu2 }
 0x355   : > { %556 = vst.msk [vmem:[%s180_s21 + $0x8] sm:$0xff] %vm185_vm0, %v552_v28 }
 0x356   : > { %947 = shalt.err (!%p944_p10)
}
 0x357   : > { %s1000_s5 = smov 128   ;;  %s1001_s7 = smov 8  }
 0x358   : > { %800 = dma.vmem_to_hbm [thread:$0]  (%p1084_p7), %s571_s22, 256, %s573_s24, %s558_s25, %s1000_s5, %s1000_s5, %s1001_s7  }
 0x359 PF: > { %s587_s14 = sand.u32 1, %s978_s9   ;;  %p1215_p12 = scmp.ge.s32.totalorder %s990_s12, 2 }
 0x35a   : > { %s588_s15 = scalar_lea.sflag [#allocation5], %s587_s14 }
 0x35b   : > { %p811_p13 = pnand %p1215_p12, %p1052_p6 }
 0x35d   : > { %p812_p0 = pneg %p811_p13 }
 0x35f   : > { %973 = dma.done.wait (%p812_p0), %s588_s15, 256  }
 0x360   : > { %975 = vsyncadd (%p812_p0), %s588_s15, 4294967040  ;;  %p16_p3 = scmp.ge.s32.totalorder %s1070_s23, 4   ;;  %s1216_s9 = smov %s982_s10 }
 0x361   : > { %s1217_s10 = smov %s986_s11  ;;  %s1218_s11 = smov %s1080_s28 }
 0x362   : > { %s1219_s12 = smov %s1070_s23  ;;  %18 = sbr.rel (!%p16_p3) target bundleno = 6 (0x6), region = 79 }
 0x367   :  { %594 = vsyncpa [#allocation4], 1 }
 0x368   :  { %596 = vsyncpa [#allocation4 + $0x1], 1 }
 0x369   :  { %597 = vsyncpa [#allocation7], 1 }
 0x36a   :  { %598 = vsyncpa [#allocation5], 1 }
 0x36b   :  { %600 = vsyncpa [#allocation5 + $0x1], 1 }

</bundles_post_ra>
